<compile_context>
chip_gen: v5e
topology: v5e:2x2
jax: 0.10.0
libtpu: 0.0.40
codegen_flags: <defaults>
</compile_context>

<pallas_src>
import jax
import jax.numpy as jnp
from jax import lax
from jax.experimental import pallas as pl
from jax.experimental.pallas import tpu as pltpu


_LANES = 2048                    # lane width of the streamed slab (multiple of 128)
_VMEM_INPUT_BUDGET = 12 << 20    # bytes for all double-buffered input blocks per call
_NUM_CORE_SPLITS = 2             # leading "parallel" grid axis (uses both v7x TCs)


def _cdiv(a, b):
    return -(-a // b)


def _round_up(a, b):
    return _cdiv(a, b) * b


def _make_kernel(n_in, pred_flags, tile_rows, lanes, rows_valid,
                 steps_per_split, total_steps):
    """Builds the per-call kernel.

    pred_flags[i] is True for the "pred" stream (sum of log(1 - x)) and False
    for the "true" stream (sum of log(x)).  All geometry is static.
    """

    def kernel(*refs):
        x_refs = refs[:n_in]
        acc_refs = refs[n_in:2 * n_in]
        c = pl.program_id(0)          # core split (parallel axis)
        k = pl.program_id(1)          # row-block step within the split

        @pl.when(k == 0)
        def _init():
            for acc in acc_refs:
                acc[...] = jnp.zeros_like(acc)

        g = c * steps_per_split + k   # global row-block index

        def accumulate(masked):
            if masked:
                row = g * tile_rows + lax.broadcasted_iota(
                    jnp.int32, (tile_rows, 1), 0)
                keep = row < rows_valid
            for x_ref, acc, is_pred in zip(x_refs, acc_refs, pred_flags):
                x = x_ref[...].astype(jnp.float32)
                # TODO(synk): jnp.log1p(-x) would be more accurate for pred
                # values near 0; log(1 - x) kept to match the reference.
                v = jnp.log(1.0 - x) if is_pred else jnp.log(x)
                if masked:
                    v = jnp.where(keep, v, 0.0)
                # Per-step column sum (VALU work, free under the HBM bound)
                # into the small (1, lanes) resident output block.
                acc[...] += jnp.sum(v, axis=0, keepdims=True)

        last = total_steps - 1
        if rows_valid == total_steps * tile_rows:
            # No partial tail block; only skip overflow steps of an uneven
            # core split.
            @pl.when(g <= last)
            def _full():
                accumulate(masked=False)
        else:
            @pl.when(g < last)
            def _full():
                accumulate(masked=False)

            @pl.when(g == last)
            def _tail():
                accumulate(masked=True)

    return kernel


def _launch(mats, pred_flags, block_budget_bytes):
    """One pallas_call over one or two equally-shaped (rows, _LANES) slabs."""
    rows, lanes = mats[0].shape
    n_in = len(mats)
    max_item = max(m.dtype.itemsize for m in mats)
    row_align = max(max(8, 32 // m.dtype.itemsize) for m in mats)

    per_input_bytes = max(block_budget_bytes // (2 * n_in),
                          lanes * max_item * row_align)
    tile_rows = (per_input_bytes // (lanes * max_item)) // row_align * row_align
    tile_rows = max(row_align, min(rows, tile_rows))

    total_steps = _cdiv(rows, tile_rows)
    nsplit = _NUM_CORE_SPLITS if total_steps >= _NUM_CORE_SPLITS else 1
    steps_per_split = _cdiv(total_steps, nsplit)

    if nsplit * steps_per_split == total_steps:
        def in_idx(c, k):
            return (c * steps_per_split + k, 0)
    else:
        # Uneven split: clamp the block index for the overflow steps (their
        # contribution is skipped inside the kernel; the repeated index also
        # avoids a redundant DMA).
        def in_idx(c, k):
            return (jnp.minimum(c * steps_per_split + k, total_steps - 1), 0)

    kernel = _make_kernel(n_in, tuple(pred_flags), tile_rows, lanes, rows,
                          steps_per_split, total_steps)

    partials = pl.pallas_call(
        kernel,
        out_shape=tuple(
            jax.ShapeDtypeStruct((nsplit, 1, lanes), jnp.float32)
            for _ in range(n_in)),
        grid_spec=pltpu.PrefetchScalarGridSpec(
            num_scalar_prefetch=0,
            grid=(nsplit, steps_per_split),
            in_specs=[pl.BlockSpec((tile_rows, lanes), in_idx) for _ in mats],
            out_specs=tuple(
                pl.BlockSpec((None, 1, lanes), lambda c, k: (c, 0, 0))
                for _ in range(n_in)),
        ),
        compiler_params=pltpu.CompilerParams(
            dimension_semantics=("parallel", "arbitrary")),
    )(*mats)

    # Tiny (nsplit x 1 x lanes) reduction done by XLA in the epilogue.
    return [jnp.sum(p) for p in partials]


def _prepare_stream(outputs, neutral_fill):
    """Flatten one list of discriminator outputs into a lane-dense
    (rows, _LANES) slab in its native dtype.

    Only a < row_align*_LANES element neutral tail (log term exactly 0) is
    appended, inside the single concatenate.  A single head that is already
    slab-aligned is passed through with zero copies.
    """
    flats = [o.reshape(-1) for o in outputs]            # bitcast reshapes
    dtype = jnp.result_type(*[f.dtype for f in flats])
    itemsize = jnp.dtype(dtype).itemsize
    row_align = max(8, 32 // itemsize)                  # 8 f32 / 16 bf16 / 32 int8
    chunk = row_align * _LANES
    n = sum(int(f.shape[0]) for f in flats)
    padded = _round_up(max(n, 1), chunk)

    if len(flats) == 1 and flats[0].dtype == dtype and n == padded:
        stream = flats[0]                               # zero-copy fast path
    else:
        parts = list(flats)
        if padded != n:
            parts.append(jnp.full((padded - n,), neutral_fill, dtype))
        stream = jnp.concatenate(parts) if len(parts) > 1 else parts[0].astype(dtype)
    return stream.reshape(padded // _LANES, _LANES)


def final_discriminator_loss(
    disc_true_output,
    disc_pred_output,
    final_disc_loss_weight: float = 1.0,
    return_only_final_loss: bool = True,
    *,
    block_budget_bytes: int = _VMEM_INPUT_BUDGET,
):
    batch = disc_true_output[0].shape[0]

    true_mat = _prepare_stream(disc_true_output, neutral_fill=1.0)   # log(1)   = 0
    pred_mat = _prepare_stream(disc_pred_output, neutral_fill=0.0)   # log(1-0) = 0

    if true_mat.shape[0] == pred_mat.shape[0]:
        # Common case (same discriminator on real & fake): one fused call,
        # both streams share each grid step's pipeline overhead.
        sum_true, sum_pred = _launch([true_mat, pred_mat], [False, True],
                                     block_budget_bytes)
    else:
        # Diverging sizes: independent geometries, no cross-stream padding reads.
        (sum_true,) = _launch([true_mat], [False], block_budget_bytes)
        (sum_pred,) = _launch([pred_mat], [True], block_budget_bytes)

    # Scalar epilogue in XLA: batch / weight never enter the kernel, so
    # changing the loss weight cannot trigger a Mosaic recompile.
    inv_b = 1.0 / float(batch)
    true_loss = sum_true * inv_b
    pred_loss = sum_pred * inv_b
    final_loss = -(true_loss + pred_loss) * final_disc_loss_weight

    if return_only_final_loss:
        return final_loss
    return final_loss, true_loss, pred_loss


def _reference(disc_true_output, disc_pred_output, weight=1.0):
    t = jnp.concatenate(
        [o.reshape(o.shape[0], -1).astype(jnp.float32) for o in disc_true_output],
        axis=1)
    p = jnp.concatenate(
        [o.reshape(o.shape[0], -1).astype(jnp.float32) for o in disc_pred_output],
        axis=1)
    true_loss = jnp.log(t).sum(axis=1).mean()
    pred_loss = jnp.log(1.0 - p).sum(axis=1).mean()
    return -(true_loss + pred_loss) * weight, true_loss, pred_loss


def _check(got, want, rtol=2e-4, atol=1e-3):
    assert jnp.allclose(got, want, rtol=rtol, atol=atol), (got, want)


if __name__ == "__main__":
    key = jax.random.PRNGKey(0)
    ks = jax.random.split(key, 9)
    B = 2

    # --- Case 1: f32 heads, equal true/pred geometry -> fused single call. ---
    disc_true = [
        jax.nn.sigmoid(jax.random.normal(ks[0], (B, 4, 16, 16), jnp.float32)),
        jax.nn.sigmoid(jax.random.normal(ks[1], (B, 1, 8, 8), jnp.float32)),
    ]
    disc_pred = [
        jax.nn.sigmoid(jax.random.normal(ks[2], (B, 4, 16, 16), jnp.float32)),
        jax.nn.sigmoid(jax.random.normal(ks[3], (B, 1, 8, 8), jnp.float32)),
    ]
    out1 = jax.block_until_ready(final_discriminator_loss(
        disc_true, disc_pred, 1.0, return_only_final_loss=False))
    ref1 = _reference(disc_true, disc_pred, 1.0)
    for got, want in zip(out1, ref1):
        _check(got, want)
    only1 = jax.block_until_ready(final_discriminator_loss(
        disc_true, disc_pred, 1.0, return_only_final_loss=True))
    _check(only1, ref1[0])

    # --- Case 2: bf16 heads, unequal sizes -> native-dtype streaming,
    #     per-stream calls with independent geometries. ------------------------
    true2 = [
        jax.nn.sigmoid(jax.random.normal(ks[4], (B, 4, 16, 16), jnp.float32))
        .astype(jnp.bfloat16),
    ]
    pred2 = [
        jax.nn.sigmoid(jax.random.normal(ks[5], (B, 4, 16, 16), jnp.float32))
        .astype(jnp.bfloat16),
        jax.nn.sigmoid(jax.random.normal(ks[6], (B, 16, 32, 32), jnp.float32))
        .astype(jnp.bfloat16),
    ]
    out2 = jax.block_until_ready(final_discriminator_loss(
        true2, pred2, 0.5, return_only_final_loss=False))
    ref2 = _reference(true2, pred2, 0.5)
    for got, want in zip(out2, ref2):
        _check(got, want)

    # --- Case 3: small block budget to exercise the multi-step grid, the
    #     dual-core "parallel" split, the uneven-split clamp and the in-kernel
    #     row-tail mask (same code path larger inputs take with the default
    #     budget). ------------------------------------------------------------
    true3 = [jax.nn.sigmoid(jax.random.normal(ks[7], (B, 5, 64, 128), jnp.float32))]
    pred3 = [jax.nn.sigmoid(jax.random.normal(ks[8], (B, 5, 64, 128), jnp.float32))]
    out3 = jax.block_until_ready(final_discriminator_loss(
        true3, pred3, 1.0, return_only_final_loss=False,
        block_budget_bytes=512 * 1024))
    ref3 = _reference(true3, pred3, 1.0)
    for got, want in zip(out3, ref3):
        _check(got, want)

    print("KERNEL_OK")
</pallas_src>

<mosaic_0001>
module attributes {stable_mosaic.version = 11 : i64} {
  func.func @kernel(%arg0: i32, %arg1: i32, %arg2: memref<8x2048xf32, #tpu.memory_space<vmem>>, %arg3: memref<8x2048xf32, #tpu.memory_space<vmem>>, %arg4: memref<1x1x2048xf32, #tpu.memory_space<vmem>>, %arg5: memref<1x1x2048xf32, #tpu.memory_space<vmem>>) attributes {dimension_semantics = [#tpu.dimension_semantics<parallel>, #tpu.dimension_semantics<arbitrary>], iteration_bounds = array<i64: 1, 1>, scalar_prefetch = 0 : i64, scratch_operands = 0 : i64, tpu.core_type = #tpu.core_type<tc>, window_params = [{transform_indices = @transform_0, window_bounds = array<i64: 8, 2048>}, {transform_indices = @transform_1, window_bounds = array<i64: 8, 2048>}, {transform_indices = @transform_2, window_bounds = array<i64: 1, 1, 2048>}, {transform_indices = @transform_3, window_bounds = array<i64: 1, 1, 2048>}]} {
    %c0_i32 = arith.constant 0 : i32
    %0 = arith.cmpi eq, %arg1, %c0_i32 : i32
    %1 = arith.extui %0 : i1 to i32
    %c0_i32_0 = arith.constant 0 : i32
    %2 = arith.cmpi ne, %1, %c0_i32_0 : i32
    scf.if %2 {
      %cst = arith.constant 0.000000e+00 : f32
      %8 = vector.broadcast %cst : f32 to vector<1x2048xf32>
      %c0 = arith.constant 0 : index
      %c0_3 = arith.constant 0 : index
      %c0_4 = arith.constant 0 : index
      %9 = vector.load %arg4[%c0, %c0_3, %c0_4] : memref<1x1x2048xf32, #tpu.memory_space<vmem>>, vector<1x1x2048xf32>
      %10 = vector.shape_cast %9 : vector<1x1x2048xf32> to vector<1x2048xf32>
      %11 = vector.shape_cast %8 : vector<1x2048xf32> to vector<1x1x2048xf32>
      tpu.vector_store %arg4[%c0, %c0_3, %c0_4], %11 {strides = array<i32>} : memref<1x1x2048xf32, #tpu.memory_space<vmem>>, vector<1x1x2048xf32>,
      %cst_5 = arith.constant 0.000000e+00 : f32
      %12 = vector.broadcast %cst_5 : f32 to vector<1x2048xf32>
      %c0_6 = arith.constant 0 : index
      %c0_7 = arith.constant 0 : index
      %c0_8 = arith.constant 0 : index
      %13 = vector.load %arg5[%c0_6, %c0_7, %c0_8] : memref<1x1x2048xf32, #tpu.memory_space<vmem>>, vector<1x1x2048xf32>
      %14 = vector.shape_cast %13 : vector<1x1x2048xf32> to vector<1x2048xf32>
      %15 = vector.shape_cast %12 : vector<1x2048xf32> to vector<1x1x2048xf32>
      tpu.vector_store %arg5[%c0_6, %c0_7, %c0_8], %15 {strides = array<i32>} : memref<1x1x2048xf32, #tpu.memory_space<vmem>>, vector<1x1x2048xf32>,
    } else {
    }
    %c1_i32 = arith.constant 1 : i32
    %3 = arith.muli %arg0, %c1_i32 : i32
    %4 = arith.addi %3, %arg1 : i32
    %c0_i32_1 = arith.constant 0 : i32
    %5 = arith.cmpi sle, %4, %c0_i32_1 : i32
    %6 = arith.extui %5 : i1 to i32
    %c0_i32_2 = arith.constant 0 : i32
    %7 = arith.cmpi ne, %6, %c0_i32_2 : i32
    scf.if %7 {
      %c0 = arith.constant 0 : index
      %c0_3 = arith.constant 0 : index
      %8 = vector.load %arg2[%c0, %c0_3] : memref<8x2048xf32, #tpu.memory_space<vmem>>, vector<8x2048xf32>
      %9 = math.log %8 : vector<8x2048xf32>
      %c0_4 = arith.constant 0 : index
      %c0_5 = arith.constant 0 : index
      %c0_6 = arith.constant 0 : index
      %10 = vector.load %arg4[%c0_4, %c0_5, %c0_6] : memref<1x1x2048xf32, #tpu.memory_space<vmem>>, vector<1x1x2048xf32>
      %11 = vector.shape_cast %10 : vector<1x1x2048xf32> to vector<1x2048xf32>
      %cst = arith.constant dense<0.000000e+00> : vector<2048xf32>
      %12 = vector.multi_reduction <add>, %9, %cst [0] : vector<8x2048xf32> to vector<2048xf32>
      %13 = vector.shape_cast %12 : vector<2048xf32> to vector<1x2048xf32>
      %14 = arith.addf %11, %13 : vector<1x2048xf32>
      %c0_7 = arith.constant 0 : index
      %c0_8 = arith.constant 0 : index
      %c0_9 = arith.constant 0 : index
      %15 = vector.load %arg4[%c0_7, %c0_8, %c0_9] : memref<1x1x2048xf32, #tpu.memory_space<vmem>>, vector<1x1x2048xf32>
      %16 = vector.shape_cast %15 : vector<1x1x2048xf32> to vector<1x2048xf32>
      %17 = vector.shape_cast %14 : vector<1x2048xf32> to vector<1x1x2048xf32>
      tpu.vector_store %arg4[%c0_7, %c0_8, %c0_9], %17 {strides = array<i32>} : memref<1x1x2048xf32, #tpu.memory_space<vmem>>, vector<1x1x2048xf32>,
      %c0_10 = arith.constant 0 : index
      %c0_11 = arith.constant 0 : index
      %18 = vector.load %arg3[%c0_10, %c0_11] : memref<8x2048xf32, #tpu.memory_space<vmem>>, vector<8x2048xf32>
      %cst_12 = arith.constant 1.000000e+00 : f32
      %19 = vector.broadcast %cst_12 : f32 to vector<8x2048xf32>
      %20 = arith.subf %19, %18 : vector<8x2048xf32>
      %21 = math.log %20 : vector<8x2048xf32>
      %c0_13 = arith.constant 0 : index
      %c0_14 = arith.constant 0 : index
      %c0_15 = arith.constant 0 : index
      %22 = vector.load %arg5[%c0_13, %c0_14, %c0_15] : memref<1x1x2048xf32, #tpu.memory_space<vmem>>, vector<1x1x2048xf32>
      %23 = vector.shape_cast %22 : vector<1x1x2048xf32> to vector<1x2048xf32>
      %cst_16 = arith.constant dense<0.000000e+00> : vector<2048xf32>
      %24 = vector.multi_reduction <add>, %21, %cst_16 [0] : vector<8x2048xf32> to vector<2048xf32>
      %25 = vector.shape_cast %24 : vector<2048xf32> to vector<1x2048xf32>
      %26 = arith.addf %23, %25 : vector<1x2048xf32>
      %c0_17 = arith.constant 0 : index
      %c0_18 = arith.constant 0 : index
      %c0_19 = arith.constant 0 : index
      %27 = vector.load %arg5[%c0_17, %c0_18, %c0_19] : memref<1x1x2048xf32, #tpu.memory_space<vmem>>, vector<1x1x2048xf32>
      %28 = vector.shape_cast %27 : vector<1x1x2048xf32> to vector<1x2048xf32>
      %29 = vector.shape_cast %26 : vector<1x2048xf32> to vector<1x1x2048xf32>
      tpu.vector_store %arg5[%c0_17, %c0_18, %c0_19], %29 {strides = array<i32>} : memref<1x1x2048xf32, #tpu.memory_space<vmem>>, vector<1x1x2048xf32>,
    } else {
    }
    return
  }
  func.func @transform_0(%arg0: i32, %arg1: i32) -> (i32, i32) {
    %c1_i32 = arith.constant 1 : i32
    %0 = arith.muli %arg0, %c1_i32 : i32
    %1 = arith.addi %0, %arg1 : i32
    %c0_i32 = arith.constant 0 : i32
    %c0_i32_0 = arith.constant 0 : i32
    return %1, %c0_i32 : i32, i32
  }
  func.func @transform_1(%arg0: i32, %arg1: i32) -> (i32, i32) {
    %c1_i32 = arith.constant 1 : i32
    %0 = arith.muli %arg0, %c1_i32 : i32
    %1 = arith.addi %0, %arg1 : i32
    %c0_i32 = arith.constant 0 : i32
    %c0_i32_0 = arith.constant 0 : i32
    return %1, %c0_i32 : i32, i32
  }
  func.func @transform_2(%arg0: i32, %arg1: i32) -> (i32, i32, i32) {
    %c0_i32 = arith.constant 0 : i32
    %c0_i32_0 = arith.constant 0 : i32
    %c0_i32_1 = arith.constant 0 : i32
    return %arg0, %c0_i32, %c0_i32_0 : i32, i32, i32
  }
  func.func @transform_3(%arg0: i32, %arg1: i32) -> (i32, i32, i32) {
    %c0_i32 = arith.constant 0 : i32
    %c0_i32_0 = arith.constant 0 : i32
    %c0_i32_1 = arith.constant 0 : i32
    return %arg0, %c0_i32, %c0_i32_0 : i32, i32, i32
  }
}

</mosaic_0001>

<bundles_post_ra>
// kernel: tpu_custom_call.1
= control target key start
LH: loop header
LB: loop body
LE: loop exit
PB: predicated region body
PF: predicated region fallthrough
CT: control target
= control target key end

     0   :  { %9 = vsyncpa [#allocation3], 0  ;;  %s785_s0 = inlined_call_operand.hbm [shape: f32[8,2048], index: 0, kind: input, shape index: {}]   ;;  %s786_s1 = inlined_call_operand.hbm [shape: f32[8,2048], index: 1, kind: input, shape index: {}]   ;;  %s787_s2 = inlined_call_operand.hbm [shape: f32[1,1,2048], index: 2, kind: output, shape index: {0}]   ;;  %s788_s3 = inlined_call_operand.hbm [shape: f32[1,1,2048], index: 3, kind: output, shape index: {1}]  }
   0x1   :  { %10 = vsyncpa [#allocation6], 0 }
   0x2   :  { %11 = vsyncpa [#allocation4], 0 }
   0x3   :  { %12 = vsyncpa [#allocation9], 0  ;;  %s22_s14 = sshll.u32 %s785_s0, 4  ;;  %s688_s15 = smov [#allocation2]   ;;  %s23_s14 = int_to_ptr.hbm [resolvable:$true] %s22_s14 }
   0x4   :  { %s24_s16 = sshll.u32 %s688_s15, 4  ;;  %s37_s19 = sshll.u32 %s786_s1, 4  ;;  %s25_s16 = int_to_ptr.vmem [resolvable:$true] %s24_s16  ;;  %s38_s19 = int_to_ptr.hbm [resolvable:$true] %s37_s19 }
   0x5   :  { %27 = dma.hbm_to_vmem [thread:$0]  %s23_s14, 2048, %s25_s16, [#allocation3]  }
   0x6   :  { %s689_s20 = smov [#allocation5]  }
   0x7   :  { %s39_s21 = sshll.u32 %s689_s20, 4  ;;  %s40_s21 = int_to_ptr.vmem [resolvable:$true] %s39_s21 }
   0x8   :  { %42 = dma.hbm_to_vmem [thread:$0]  %s38_s19, 2048, %s40_s21, [#allocation6]  }
   0x9   :  { %680 = dma.done.wait [#allocation3], 2048  }
   0xa   :  { %681 = vsyncadd [#allocation3], 4294965248 }
   0xb   :  { %682 = dma.done.wait [#allocation6], 2048  }
   0xc   :  { %683 = vsyncadd [#allocation6], 4294965248  ;;  %v66_v0 = vld [vmem:[#allocation2] sm:$0xff]  ;;  %v67_v1 = vld [vmem:[#allocation2 + $0x8] sm:$0xff]  ;;  %vm242_vm0 = vcmask 1040384   ;;  %vm244_vm1 = vcmask 1042434  }
   0xd   :  { %v68_v2 = vld [vmem:[#allocation2 + $0x10] sm:$0xff]  ;;  %v69_v3 = vld [vmem:[#allocation2 + $0x18] sm:$0xff]  ;;  %520 = vlog2.f32 %v66_v0  ;;  %v70_v4 = vld [vmem:[#allocation2 + $0x20] sm:$0xff]  ;;  %vm246_vm2 = vcmask 1041408   ;;  %vm248_vm3 = vcmask 1044484   ;;  %vm250_vm4 = vcmask 1046534  }
   0xe   :  { %522 = vlog2.f32 %v67_v1  ;;  %v71_v5 = vld [vmem:[#allocation2 + $0x28] sm:$0xff]  ;;  %v72_v6 = vld [vmem:[#allocation2 + $0x30] sm:$0xff]  ;;  %v73_v7 = vld [vmem:[#allocation2 + $0x38] sm:$0xff]  ;;  %vm252_vm5 = vcmask 1045508   ;;  %vm254_vm6 = vcmask 1043456   ;;  %s690_s0 = smov [#allocation7]  }
   0xf   :  { %524 = vlog2.f32 %v68_v2  ;;  %v718_v8 = vld [vmem:[#allocation5] sm:$0xff]  ;;  %v720_v9 = vld [vmem:[#allocation5 + $0x8] sm:$0xff]  ;;  %v722_v11 = vld [vmem:[#allocation5 + $0x10] sm:$0xff]  ;;  %s760_s1 = sshll.u32 %s690_s0, 4  ;;  %s488_s24 = sshll.u32 %s787_s2, 4  ;;  %s487_s1 = int_to_ptr.vmem [resolvable:$true] %s760_s1  ;;  %s489_s24 = int_to_ptr.hbm [resolvable:$true] %s488_s24 }
  0x10   :  { %526 = vlog2.f32 %v69_v3  ;;  %v74_v10 = vld [vmem:[#allocation2 + $0x40] sm:$0xff]  ;;  %v724_v12 = vld [vmem:[#allocation5 + $0x18] sm:$0xff]  ;;  %v75_v14 = vld [vmem:[#allocation2 + $0x48] sm:$0xff]  ;;  %v285_v20 = vsub.f32 1.0, %v718_v8  ;;  %v286_v21 = vsub.f32 1.0, %v720_v9  ;;  %v287_v25 = vsub.f32 1.0, %v722_v11 }
  0x11   :  { %528 = vlog2.f32 %v70_v4  ;;  %v726_v15 = vld [vmem:[#allocation5 + $0x20] sm:$0xff]  ;;  %v76_v18 = vld [vmem:[#allocation2 + $0x50] sm:$0xff]  ;;  %v728_v19 = vld [vmem:[#allocation5 + $0x28] sm:$0xff]  ;;  %v288_v26 = vsub.f32 1.0, %v724_v12  ;;  %s691_s2 = smov [#allocation8]   ;;  %s499_s28 = sshll.u32 %s788_s3, 4  ;;  %s500_s28 = int_to_ptr.hbm [resolvable:$true] %s499_s28 }
  0x12   :  { %530 = vlog2.f32 %v71_v5  ;;  %v77_v24 = vld [vmem:[#allocation2 + $0x58] sm:$0xff]  ;;  %v78_v30 = vld [vmem:[#allocation2 + $0x60] sm:$0xff]  ;;  %v289_v31 = vsub.f32 1.0, %v726_v15  ;;  %v290_v35 = vsub.f32 1.0, %v728_v19  ;;  %s497_s25 = sshll.u32 %s691_s2, 4  ;;  %s498_s25 = int_to_ptr.vmem [resolvable:$true] %s497_s25 }
  0x13   :  { %v521_v13 = vpop.eup %520  ;;  %532 = vlog2.f32 %v72_v6 }
  0x14   :  { %v523_v16 = vpop.eup %522  ;;  %v83_v17 = vmul.f32 0.6931472, %v521_v13  ;;  %534 = vlog2.f32 %v73_v7 }
  0x15   :  { %v525_v22 = vpop.eup %524  ;;  %v85_v23 = vmul.f32 0.6931472, %v523_v16  ;;  %536 = vlog2.f32 %v74_v10 }
  0x16   :  { %v527_v27 = vpop.eup %526  ;;  %v87_v28 = vmul.f32 0.6931472, %v525_v22  ;;  %v116_v29 = vrot.slane %v83_v17, 4  ;;  %538 = vlog2.f32 %v75_v14 }
  0x17   :  { %v529_v32 = vpop.eup %528  ;;  %v89_v33 = vmul.f32 0.6931472, %v527_v27  ;;  %v122_v34 = vrot.slane %v85_v23, 4  ;;  %540 = vlog2.f32 %v76_v18 }
  0x18   :  { %v531_v36 = vpop.eup %530  ;;  %v91_v37 = vmul.f32 0.6931472, %v529_v32  ;;  %v117_v38 = vadd.f32 %v116_v29, %v83_v17  ;;  %v128_v39 = vrot.slane %v87_v28, 4  ;;  %542 = vlog2.f32 %v77_v24 }
  0x19   :  { %v533_v40 = vpop.eup %532  ;;  %v93_v41 = vmul.f32 0.6931472, %v531_v36  ;;  %v123_v42 = vadd.f32 %v122_v34, %v85_v23  ;;  %v134_v43 = vrot.slane %v89_v33, 4  ;;  %544 = vlog2.f32 %v78_v30 }
  0x1a   :  { %v535_v44 = vpop.eup %534  ;;  %v95_v45 = vmul.f32 0.6931472, %v533_v40  ;;  %v118_v46 = vrot.slane %v117_v38, 2  ;;  %v129_v47 = vadd.f32 %v128_v39, %v87_v28  ;;  %v140_v48 = vrot.slane %v91_v37, 4 }
  0x1b   :  { %v537_v49 = vpop.eup %536  ;;  %v97_v50 = vmul.f32 0.6931472, %v535_v44  ;;  %v124_v51 = vrot.slane %v123_v42, 2  ;;  %v135_v52 = vadd.f32 %v134_v43, %v89_v33  ;;  %v146_v53 = vrot.slane %v93_v41, 4 }
  0x1c   :  { %v539_v54 = vpop.eup %538  ;;  %v119_v55 = vadd.f32 %v118_v46, %v117_v38  ;;  %v130_v56 = vrot.slane %v129_v47, 2  ;;  %v141_v57 = vadd.f32 %v140_v48, %v91_v37  ;;  %v152_v58 = vrot.slane %v95_v45, 4  ;;  %v79_v46 = vld [vmem:[#allocation2 + $0x68] sm:$0xff] }
  0x1d   :  { %v541_v59 = vpop.eup %540  ;;  %v125_v60 = vadd.f32 %v124_v51, %v123_v42  ;;  %v136_v61 = vrot.slane %v135_v52, 2  ;;  %v147_v62 = vadd.f32 %v146_v53, %v93_v41  ;;  %v158_v63 = vrot.slane %v97_v50, 4 }
  0x1e   :  { %v543_v0 = vpop.eup %542  ;;  %v120_v1 = vrot.slane %v119_v55, 1  ;;  %v131_v2 = vadd.f32 %v130_v56, %v129_v47  ;;  %v142_v3 = vrot.slane %v141_v57, 2  ;;  %v153_v4 = vadd.f32 %v152_v58, %v95_v45  ;;  %v81_v56 = vld [vmem:[#allocation2 + $0x78] sm:$0xff] }
  0x1f   :  { %v545_v5 = vpop.eup %544  ;;  %v126_v6 = vrot.slane %v125_v60, 1  ;;  %v137_v7 = vadd.f32 %v136_v61, %v135_v52  ;;  %v148_v10 = vrot.slane %v147_v62, 2  ;;  %v159_v13 = vadd.f32 %v158_v63, %v97_v50  ;;  %v80_v50 = vld [vmem:[#allocation2 + $0x70] sm:$0xff] }
  0x20   :  { %v121_v14 = vadd.f32 %v120_v1, %v119_v55  ;;  %v132_v16 = vrot.slane %v131_v2, 1  ;;  %v143_v17 = vadd.f32 %v142_v3, %v141_v57  ;;  %v154_v18 = vrot.slane %v153_v4, 2 }
  0x21   :  { %v127_v22 = vadd.f32 %v126_v6, %v125_v60  ;;  %v138_v23 = vrot.slane %v137_v7, 1  ;;  %v149_v24 = vadd.f32 %v148_v10, %v147_v62  ;;  %v160_v27 = vrot.slane %v159_v13, 2 }
  0x22   :  { %v133_v28 = vadd.f32 %v132_v16, %v131_v2  ;;  %v144_v29 = vrot.slane %v143_v17, 1  ;;  %v155_v30 = vadd.f32 %v154_v18, %v153_v4  ;;  %v99_v32 = vmul.f32 0.6931472, %v537_v49 }
  0x23   :  { %v139_v33 = vadd.f32 %v138_v23, %v137_v7  ;;  %v150_v34 = vrot.slane %v149_v24, 1  ;;  %v161_v36 = vadd.f32 %v160_v27, %v159_v13  ;;  %v228_v37 = vrot.slane %v127_v22, 7 }
  0x24   :  { %v145_v38 = vadd.f32 %v144_v29, %v143_v17  ;;  %v156_v39 = vrot.slane %v155_v30, 1  ;;  %v229_v40 = vrot.slane %v133_v28, 6  ;;  %v101_v41 = vmul.f32 0.6931472, %v539_v54  ;;  %v275_v28 = vld [vmem:[#allocation5 + $0x30] sm:$0xff] }
  0x25   :  { %v151_v42 = vadd.f32 %v150_v34, %v149_v24  ;;  %v162_v43 = vrot.slane %v161_v36, 1  ;;  %v230_v44 = vrot.slane %v139_v33, 5  ;;  %v243_v45 = vsel %vm242_vm0, %v121_v14, %v228_v37 }
  0x26   :  { %v157_v47 = vadd.f32 %v156_v39, %v155_v30  ;;  %v231_v48 = vrot.slane %v145_v38, 4  ;;  %v103_v51 = vmul.f32 0.6931472, %v541_v59  ;;  %v105_v52 = vmul.f32 0.6931472, %v543_v0 }
  0x27   :  { %v163_v49 = vadd.f32 %v162_v43, %v161_v36  ;;  %v232_v53 = vrot.slane %v151_v42, 3  ;;  %v245_v55 = vsel %vm244_vm1, %v229_v40, %v230_v44  ;;  %v107_v57 = vmul.f32 0.6931472, %v545_v5 }
  0x28   :  { %v233_v58 = vrot.slane %v157_v47, 2  ;;  %v247_v54 = vsel %vm246_vm2, %v243_v45, %v245_v55  ;;  %546 = vlog2.f32 %v79_v46  ;;  %v164_v60 = vrot.slane %v99_v32, 4  ;;  %v276_v46 = vld [vmem:[#allocation5 + $0x38] sm:$0xff] }
  0x29   :  { %v234_v61 = vrot.slane %v163_v49, 1  ;;  %v249_v62 = vsel %vm248_vm3, %v231_v48, %v232_v53  ;;  %548 = vlog2.f32 %v80_v50  ;;  %v170_v63 = vrot.slane %v101_v41, 4 }
  0x2a   :  { %550 = vlog2.f32 %v81_v56  ;;  %v165_v1 = vadd.f32 %v164_v60, %v99_v32  ;;  %v176_v59 = vrot.slane %v103_v51, 4  ;;  %v182_v0 = vrot.slane %v105_v52, 4 }
  0x2b   :  { %v251_v2 = vsel %vm250_vm4, %v233_v58, %v234_v61  ;;  %v171_v3 = vadd.f32 %v170_v63, %v101_v41  ;;  %v188_v4 = vrot.slane %v107_v57, 4  ;;  %552 = vlog2.f32 %v285_v20 }
  0x2c   :  { %v253_v5 = vsel %vm252_vm5, %v249_v62, %v251_v2  ;;  %v166_v6 = vrot.slane %v165_v1, 2  ;;  %v177_v7 = vadd.f32 %v176_v59, %v103_v51  ;;  %v183_v10 = vadd.f32 %v182_v0, %v105_v52 }
  0x2d   :  { %v255_v13 = vsel %vm254_vm6, %v247_v54, %v253_v5  ;;  %v172_v14 = vrot.slane %v171_v3, 2  ;;  %v189_v16 = vadd.f32 %v188_v4, %v107_v57  ;;  %554 = vlog2.f32 %v286_v21 }
  0x2e   :  { %v547_v17 = vpop.eup %546  ;;  %v167_v18 = vadd.f32 %v166_v6, %v165_v1  ;;  %v178_v22 = vrot.slane %v177_v7, 2  ;;  %v184_v23 = vrot.slane %v183_v10, 2  ;;  %556 = vlog2.f32 %v287_v25  ;;  %267 = vst [vmem:[#allocation7] sm:$0xff] %v255_v13 }
  0x2f   :  { %v549_v24 = vpop.eup %548  ;;  %v109_v27 = vmul.f32 0.6931472, %v547_v17  ;;  %v173_v8 = vadd.f32 %v172_v14, %v171_v3  ;;  %v190_v20 = vrot.slane %v189_v16, 2  ;;  %v291_v42 = vsub.f32 1.0, %v275_v28 }
  0x30   :  { %v551_v29 = vpop.eup %550  ;;  %v111_v30 = vmul.f32 0.6931472, %v549_v24  ;;  %v168_v32 = vrot.slane %v167_v18, 1  ;;  %v179_v33 = vadd.f32 %v178_v22, %v177_v7  ;;  %v185_v34 = vadd.f32 %v184_v23, %v183_v10 }
  0x31   :  { %v553_v9 = vpop.eup %552  ;;  %v113_v21 = vmul.f32 0.6931472, %v551_v29  ;;  %v174_v36 = vrot.slane %v173_v8, 1  ;;  %v191_v37 = vadd.f32 %v190_v20, %v189_v16  ;;  %v194_v38 = vrot.slane %v109_v27, 4 }
  0x32   :  { %v180_v39 = vrot.slane %v179_v33, 1  ;;  %v186_v40 = vrot.slane %v185_v34, 1  ;;  %v200_v41 = vrot.slane %v111_v30, 4  ;;  %v169_v47 = vadd.f32 %v168_v32, %v167_v18 }
  0x33   :  { %v555_v43 = vpop.eup %554  ;;  %v175_v44 = vadd.f32 %v174_v36, %v173_v8  ;;  %v192_v45 = vrot.slane %v191_v37, 1  ;;  %v195_v11 = vadd.f32 %v194_v38, %v109_v27  ;;  %v206_v25 = vrot.slane %v113_v21, 4 }
  0x34   :  { %v181_v48 = vadd.f32 %v180_v39, %v179_v33  ;;  %v187_v50 = vadd.f32 %v186_v40, %v185_v34  ;;  %v201_v51 = vadd.f32 %v200_v41, %v111_v30  ;;  %v557_v52 = vpop.eup %556  ;;  %v292_v58 = vsub.f32 1.0, %v276_v46  ;;  %v277_v40 = vld [vmem:[#allocation5 + $0x40] sm:$0xff] }
  0x35   :  { %v193_v49 = vadd.f32 %v192_v45, %v191_v37  ;;  %v196_v53 = vrot.slane %v195_v11, 2  ;;  %v207_v55 = vadd.f32 %v206_v25, %v113_v21  ;;  %v235_v56 = vrot.slane %v175_v44, 7 }
  0x36   :  { %v202_v57 = vrot.slane %v201_v51, 2  ;;  %v302_v54 = vmul.f32 0.6931472, %v553_v9  ;;  %v304_v60 = vmul.f32 0.6931472, %v555_v43  ;;  %v236_v63 = vrot.slane %v181_v48, 6 }
  0x37   :  { %v197_v61 = vadd.f32 %v196_v53, %v195_v11  ;;  %v208_v62 = vrot.slane %v207_v55, 2  ;;  %v237_v1 = vrot.slane %v187_v50, 5  ;;  %v238_v0 = vrot.slane %v193_v49, 4  ;;  %v278_v48 = vld [vmem:[#allocation5 + $0x48] sm:$0xff]  ;;  %v279_v50 = vld [vmem:[#allocation5 + $0x50] sm:$0xff] }
  0x38   :  { %v203_v59 = vadd.f32 %v202_v57, %v201_v51  ;;  %v306_v2 = vmul.f32 0.6931472, %v557_v52  ;;  %558 = vlog2.f32 %v288_v26  ;;  %v256_v5 = vsel %vm242_vm0, %v169_v47, %v235_v56 }
  0x39   :  { %v198_v3 = vrot.slane %v197_v61, 1  ;;  %v209_v4 = vadd.f32 %v208_v62, %v207_v55  ;;  %560 = vlog2.f32 %v289_v31  ;;  %v335_v7 = vrot.slane %v302_v54, 4 }
  0x3a   :  { %v204_v6 = vrot.slane %v203_v59, 1  ;;  %562 = vlog2.f32 %v290_v35  ;;  %v341_v10 = vrot.slane %v304_v60, 4  ;;  %v347_v16 = vrot.slane %v306_v2, 4 }
  0x3b   :  { %v199_v13 = vadd.f32 %v198_v3, %v197_v61  ;;  %v210_v14 = vrot.slane %v209_v4, 1  ;;  %564 = vlog2.f32 %v291_v42  ;;  %v336_v12 = vadd.f32 %v335_v7, %v302_v54  ;;  %v282_v3 = vld [vmem:[#allocation5 + $0x68] sm:$0xff] }
  0x3c   :  { %v205_v17 = vadd.f32 %v204_v6, %v203_v59  ;;  %566 = vlog2.f32 %v292_v58  ;;  %v342_v26 = vadd.f32 %v341_v10, %v304_v60  ;;  %v257_v23 = vsel %vm244_vm1, %v236_v63, %v237_v1  ;;  %v280_v58 = vld [vmem:[#allocation5 + $0x58] sm:$0xff] }
  0x3d   :  { %v211_v18 = vadd.f32 %v210_v14, %v209_v4  ;;  %v239_v22 = vrot.slane %v199_v13, 3  ;;  %v348_v15 = vadd.f32 %v347_v16, %v306_v2  ;;  %v337_v27 = vrot.slane %v336_v12, 2  ;;  %v281_v2 = vld [vmem:[#allocation5 + $0x60] sm:$0xff] }
  0x3e   :  { %v559_v31 = vpop.eup %558  ;;  %v240_v24 = vrot.slane %v205_v17, 2  ;;  %v343_v19 = vrot.slane %v342_v26, 2  ;;  %v258_v32 = vsel %vm246_vm2, %v256_v5, %v257_v23  ;;  %v293_v49 = vsub.f32 1.0, %v277_v40  ;;  %v283_v17 = vld [vmem:[#allocation5 + $0x70] sm:$0xff] }
  0x3f   :  { %v561_v35 = vpop.eup %560  ;;  %v241_v8 = vrot.slane %v211_v18, 1  ;;  %v259_v20 = vsel %vm248_vm3, %v238_v0, %v239_v22  ;;  %v308_v28 = vmul.f32 0.6931472, %v559_v31  ;;  %v349_v29 = vrot.slane %v348_v15, 2 }
  0x40   :  { %v563_v30 = vpop.eup %562  ;;  %v310_v33 = vmul.f32 0.6931472, %v561_v35  ;;  %v338_v34 = vadd.f32 %v337_v27, %v336_v12  ;;  %v344_v9 = vadd.f32 %v343_v19, %v342_v26  ;;  %v294_v61 = vsub.f32 1.0, %v278_v48 }
  0x41   :  { %v565_v21 = vpop.eup %564  ;;  %v260_v36 = vsel %vm250_vm4, %v240_v24, %v241_v8  ;;  %v312_v37 = vmul.f32 0.6931472, %v563_v30  ;;  %v350_v38 = vadd.f32 %v349_v29, %v348_v15  ;;  %v353_v39 = vrot.slane %v308_v28, 4  ;;  %v284_v24 = vld [vmem:[#allocation5 + $0x78] sm:$0xff] }
  0x42   :  { %v567_v41 = vpop.eup %566  ;;  %v261_v42 = vsel %vm252_vm5, %v259_v20, %v260_v36  ;;  %v314_v43 = vmul.f32 0.6931472, %v565_v21  ;;  %v339_v44 = vrot.slane %v338_v34, 1  ;;  %v345_v45 = vrot.slane %v344_v9, 1 }
  0x43   :  { %v262_v11 = vsel %vm254_vm6, %v258_v32, %v261_v42  ;;  %v316_v25 = vmul.f32 0.6931472, %v567_v41  ;;  %v351_v46 = vrot.slane %v350_v38, 1  ;;  %v354_v47 = vadd.f32 %v353_v39, %v308_v28 }
  0x44   :  { %v346_v51 = vadd.f32 %v345_v45, %v344_v9  ;;  %v359_v52 = vrot.slane %v310_v33, 4  ;;  %v365_v56 = vrot.slane %v312_v37, 4  ;;  %v371_v57 = vrot.slane %v314_v43, 4  ;;  %268 = vst [vmem:[#allocation7 + $0x8] sm:$0xff] %v262_v11 }
  0x45   :  { %v352_v53 = vadd.f32 %v351_v46, %v350_v38  ;;  %v355_v55 = vrot.slane %v354_v47, 2  ;;  %v377_v60 = vrot.slane %v316_v25, 4  ;;  %v295_v62 = vsub.f32 1.0, %v279_v50  ;;  %491 = dma.vmem_to_hbm [thread:$0]  %s487_s1, 256, %s489_s24, [#allocation4]  }
  0x46   :  { %v360_v54 = vadd.f32 %v359_v52, %v310_v33  ;;  %v340_v63 = vadd.f32 %v339_v44, %v338_v34  ;;  %v366_v59 = vadd.f32 %v365_v56, %v312_v37  ;;  %v372_v0 = vadd.f32 %v371_v57, %v314_v43 }
  0x47   :  { %v356_v1 = vadd.f32 %v355_v55, %v354_v47  ;;  %v378_v5 = vadd.f32 %v377_v60, %v316_v25  ;;  %v447_v6 = vrot.slane %v346_v51, 7  ;;  %v296_v7 = vsub.f32 1.0, %v280_v58 }
  0x48   :  { %v361_v4 = vrot.slane %v360_v54, 2  ;;  %v367_v13 = vrot.slane %v366_v59, 2  ;;  %v373_v14 = vrot.slane %v372_v0, 2  ;;  %v448_v16 = vrot.slane %v352_v53, 6 }
  0x49   :  { %v357_v10 = vrot.slane %v356_v1, 1  ;;  %v379_v26 = vrot.slane %v378_v5, 2  ;;  %v297_v18 = vsub.f32 1.0, %v281_v2  ;;  %v298_v22 = vsub.f32 1.0, %v282_v3 }
  0x4a   :  { %v362_v12 = vadd.f32 %v361_v4, %v360_v54  ;;  %v368_v15 = vadd.f32 %v367_v13, %v366_v59  ;;  %v374_v31 = vadd.f32 %v373_v14, %v372_v0  ;;  %568 = vlog2.f32 %v293_v49 }
  0x4b   :  { %v358_v23 = vadd.f32 %v357_v10, %v356_v1  ;;  %v380_v19 = vadd.f32 %v379_v26, %v378_v5  ;;  %v299_v35 = vsub.f32 1.0, %v283_v17  ;;  %570 = vlog2.f32 %v294_v61 }
  0x4c   :  { %v363_v27 = vrot.slane %v362_v12, 1  ;;  %v369_v8 = vrot.slane %v368_v15, 1  ;;  %v375_v20 = vrot.slane %v374_v31, 1  ;;  %572 = vlog2.f32 %v295_v62 }
  0x4d   :  { %v449_v28 = vrot.slane %v358_v23, 5  ;;  %v381_v30 = vrot.slane %v380_v19, 1  ;;  %v300_v32 = vsub.f32 1.0, %v284_v24  ;;  %574 = vlog2.f32 %v296_v7 }
  0x4e   :  { %v364_v29 = vadd.f32 %v363_v27, %v362_v12  ;;  %v370_v33 = vadd.f32 %v369_v8, %v368_v15  ;;  %v376_v34 = vadd.f32 %v375_v20, %v374_v31  ;;  %v461_v9 = vsel %vm242_vm0, %v340_v63, %v447_v6 }
  0x4f   :  { %576 = vlog2.f32 %v297_v18  ;;  %v382_v21 = vadd.f32 %v381_v30, %v380_v19  ;;  %v462_v37 = vsel %vm244_vm1, %v448_v16, %v449_v28 }
  0x50   :  { %v450_v36 = vrot.slane %v364_v29, 4  ;;  %578 = vlog2.f32 %v298_v22  ;;  %v569_v38 = vpop.eup %568  ;;  %v451_v39 = vrot.slane %v370_v33, 3  ;;  %v452_v40 = vrot.slane %v376_v34, 2 }
  0x51   :  { %580 = vlog2.f32 %v299_v35  ;;  %v571_v41 = vpop.eup %570  ;;  %v453_v42 = vrot.slane %v382_v21, 1  ;;  %v318_v43 = vmul.f32 0.6931472, %v569_v38  ;;  %v463_v45 = vsel %vm246_vm2, %v461_v9, %v462_v37 }
  0x52   :  { %582 = vlog2.f32 %v300_v32  ;;  %v573_v44 = vpop.eup %572  ;;  %v464_v11 = vsel %vm248_vm3, %v450_v36, %v451_v39  ;;  %v320_v25 = vmul.f32 0.6931472, %v571_v41 }
  0x53   :  { %v575_v46 = vpop.eup %574  ;;  %v465_v47 = vsel %vm250_vm4, %v452_v40, %v453_v42  ;;  %v322_v48 = vmul.f32 0.6931472, %v573_v44  ;;  %v383_v50 = vrot.slane %v318_v43, 4 }
  0x54   :  { %v466_v52 = vsel %vm252_vm5, %v464_v11, %v465_v47  ;;  %v324_v49 = vmul.f32 0.6931472, %v575_v46  ;;  %v389_v53 = vrot.slane %v320_v25, 4 }
  0x55   :  { %v577_v51 = vpop.eup %576  ;;  %v467_v56 = vsel %vm254_vm6, %v463_v45, %v466_v52  ;;  %v384_v58 = vadd.f32 %v383_v50, %v318_v43  ;;  %v395_v54 = vrot.slane %v322_v48, 4 }
  0x56   :  { %v579_v55 = vpop.eup %578  ;;  %v326_v57 = vmul.f32 0.6931472, %v577_v51  ;;  %v390_v62 = vadd.f32 %v389_v53, %v320_v25  ;;  %v401_v63 = vrot.slane %v324_v49, 4  ;;  %479 = vst [vmem:[#allocation8] sm:$0xff] %v467_v56 }
  0x57   :  { %v581_v60 = vpop.eup %580  ;;  %v328_v61 = vmul.f32 0.6931472, %v579_v55  ;;  %v385_v0 = vrot.slane %v384_v58, 2  ;;  %v396_v2 = vadd.f32 %v395_v54, %v322_v48 }
  0x58   :  { %v583_v1 = vpop.eup %582  ;;  %v330_v59 = vmul.f32 0.6931472, %v581_v60  ;;  %v407_v3 = vrot.slane %v326_v57, 4  ;;  %v391_v5 = vrot.slane %v390_v62, 2  ;;  %v402_v6 = vadd.f32 %v401_v63, %v324_v49 }
  0x59   :  { %v332_v4 = vmul.f32 0.6931472, %v583_v1  ;;  %v413_v7 = vrot.slane %v328_v61, 4  ;;  %v386_v10 = vadd.f32 %v385_v0, %v384_v58  ;;  %v397_v13 = vrot.slane %v396_v2, 2 }
  0x5a   :  { %v408_v14 = vadd.f32 %v407_v3, %v326_v57  ;;  %v419_v16 = vrot.slane %v330_v59, 4  ;;  %v392_v17 = vadd.f32 %v391_v5, %v390_v62  ;;  %v403_v12 = vrot.slane %v402_v6, 2 }
  0x5b   :  { %v414_v26 = vadd.f32 %v413_v7, %v328_v61  ;;  %v425_v18 = vrot.slane %v332_v4, 4  ;;  %v387_v22 = vrot.slane %v386_v10, 1  ;;  %v398_v23 = vadd.f32 %v397_v13, %v396_v2 }
  0x5c   :  { %v409_v15 = vrot.slane %v408_v14, 2  ;;  %v420_v31 = vadd.f32 %v419_v16, %v330_v59  ;;  %v393_v24 = vrot.slane %v392_v17, 1  ;;  %v404_v27 = vadd.f32 %v403_v12, %v402_v6 }
  0x5d   :  { %v415_v19 = vrot.slane %v414_v26, 2  ;;  %v426_v35 = vadd.f32 %v425_v18, %v332_v4  ;;  %v399_v8 = vrot.slane %v398_v23, 1  ;;  %v388_v34 = vadd.f32 %v387_v22, %v386_v10 }
  0x5e   :  { %v410_v20 = vadd.f32 %v409_v15, %v408_v14  ;;  %v421_v28 = vrot.slane %v420_v31, 2  ;;  %v394_v29 = vadd.f32 %v393_v24, %v392_v17  ;;  %v405_v30 = vrot.slane %v404_v27, 1 }
  0x5f   :  { %v416_v32 = vadd.f32 %v415_v19, %v414_v26  ;;  %v427_v33 = vrot.slane %v426_v35, 2  ;;  %v400_v9 = vadd.f32 %v399_v8, %v398_v23 }
  0x60   :  { %v411_v21 = vrot.slane %v410_v20, 1  ;;  %v422_v36 = vadd.f32 %v421_v28, %v420_v31  ;;  %v406_v37 = vadd.f32 %v405_v30, %v404_v27  ;;  %v454_v40 = vrot.slane %v394_v29, 7 }
  0x61   :  { %v417_v38 = vrot.slane %v416_v32, 1  ;;  %v428_v39 = vadd.f32 %v427_v33, %v426_v35  ;;  %v455_v43 = vrot.slane %v400_v9, 6 }
  0x62   :  { %v412_v41 = vadd.f32 %v411_v21, %v410_v20  ;;  %v423_v42 = vrot.slane %v422_v36, 1  ;;  %v456_v11 = vrot.slane %v406_v37, 5  ;;  %v468_v50 = vsel %vm242_vm0, %v388_v34, %v454_v40 }
  0x63   :  { %v418_v44 = vadd.f32 %v417_v38, %v416_v32  ;;  %v429_v45 = vrot.slane %v428_v39, 1 }
  0x64   :  { %v424_v25 = vadd.f32 %v423_v42, %v422_v36  ;;  %v457_v46 = vrot.slane %v412_v41, 4  ;;  %v469_v51 = vsel %vm244_vm1, %v455_v43, %v456_v11 }
  0x65   :  { %v430_v47 = vadd.f32 %v429_v45, %v428_v39  ;;  %v458_v48 = vrot.slane %v418_v44, 3  ;;  %v470_v55 = vsel %vm246_vm2, %v468_v50, %v469_v51 }
  0x66   :  { %v459_v52 = vrot.slane %v424_v25, 2 }
  0x67   :  { %v460_v49 = vrot.slane %v430_v47, 1  ;;  %v471_v53 = vsel %vm248_vm3, %v457_v46, %v458_v48 }
  0x69   :  { %v472_v56 = vsel %vm250_vm4, %v459_v52, %v460_v49 }
  0x6a   :  { %v473_v57 = vsel %vm252_vm5, %v471_v53, %v472_v56 }
  0x6b   :  { %v474_v58 = vsel %vm254_vm6, %v470_v55, %v473_v57 }
  0x6c   :  { %480 = vst [vmem:[#allocation8 + $0x8] sm:$0xff] %v474_v58 }
  0x6d   :  { %502 = dma.vmem_to_hbm [thread:$0]  %s498_s25, 256, %s500_s28, [#allocation9]  }
  0x6e   :  { %684 = dma.done.wait [#allocation4], 256  }
  0x6f   :  { %685 = vsyncadd [#allocation4], 4294967040 }
  0x70   :  { %686 = dma.done.wait [#allocation9], 256  }
  0x71   :  { %687 = vsyncadd [#allocation9], 4294967040 }
  0x72   :  { %511 = vsyncpa [#allocation3], 1 }
  0x73   :  { %512 = vsyncpa [#allocation6], 1 }
  0x74   :  { %513 = vsyncpa [#allocation4], 1 }
  0x75   :  { %514 = vsyncpa [#allocation9], 1 }

</bundles_post_ra>
